<compile_context>
chip_gen: v7x
topology: tpu7x:2x2x1
jax: 0.10.0
libtpu: 0.0.40
codegen_flags: <defaults>
</compile_context>

<pallas_src>
import jax
import jax.numpy as jnp
from jax.experimental import pallas as pl
from jax.experimental.pallas import tpu as pltpu  # noqa: F401  (TPU backend assumed)

N = 2            # batch
C = 4            # input channels
NUM_CLASSES = 10
H = W = 8        # module assumes 8x8 input
P = 4            # 2x2 pooled spatial positions (avgpool 5x5, stride 3 on 8x8)
K = 25           # 5x5 pool window elements
CK = C * K       # flattened window length = 100
EPS = 1e-5       # BatchNorm eps


def aux_head_kernel(xw_ref, w1_ref, o1_ref, w2_ref, o2_ref, wl_ref, bl_ref, out_ref):
    """Fused: ReLU -> AvgPool(5,3) -> Conv1x1 -> BN -> ReLU -> Conv2x2 -> BN -> ReLU -> Linear."""
    w1 = w1_ref[...]                                   # (CK, 128) f32, pool factor + bn1_scale folded
    o1 = o1_ref[...]                                   # (1, 128)  bn1 offset
    h1_parts = []
    for p in range(P):                                 # static 4-iteration unrolled loop
        win = jnp.maximum(xw_ref[p], 0.0)              # (N, CK): ReLU applied before pooling
        h1p = jnp.dot(win, w1,                         # pooling + 1x1 conv + bn1 scale in one matmul
                      preferred_element_type=jnp.float32)      # (N, 128)
        h1_parts.append(jnp.maximum(h1p + o1, 0.0))    # BN1 offset + ReLU
    h1 = jnp.concatenate(h1_parts, axis=-1)            # (N, P*128) = (2, 512), N-major / P-minor

    h2 = jnp.dot(h1.astype(jnp.bfloat16), w2_ref[...],           # single (2,512)x(512,768) matmul
                 preferred_element_type=jnp.float32)             # conv2 + bn2 scale (folded, bf16)
    h2 = jnp.maximum(h2 + o2_ref[...], 0.0)                      # BN2 offset + ReLU

    out_ref[...] = (jnp.dot(h2.astype(jnp.bfloat16), wl_ref[...],  # Linear(768, num_classes)
                            preferred_element_type=jnp.float32)
                    + bl_ref[...])


def extract_pool_windows(x_nchw):
    """(N, C, 8, 8) NCHW -> (P, N, C*K); window p = i*2 + j starts at (3i, 3j)."""
    wins = []
    for i in range(2):
        for j in range(2):
            w = x_nchw[:, :, 3 * i:3 * i + 5, 3 * j:3 * j + 5].reshape(N, CK)
            wins.append(w)
    return jnp.stack(wins, axis=0)                     # (4, N, 100)


def aux_head_forward(x_nchw, params):
    xw = extract_pool_windows(x_nchw)                  # (P, N, CK) f32

    # conv1 (1x1) expanded over the pool window, with 1/25 and bn1_scale folded in.
    w1_1x1 = params["conv1_w"][:, :, 0, 0].T           # (C, 128)
    w1e = jnp.repeat(w1_1x1, K, axis=0) * (1.0 / 25.0)  # (C*K, 128), rows grouped per channel
    w1e = w1e * params["bn1_scale"][None, :]            # fold bn1 scale into output columns
    o1 = params["bn1_off"].reshape(1, 128)

    # conv2 (2x2) flattened to (P*128, 768), bn2_scale folded, shipped in bf16.
    w2t = jnp.transpose(params["conv2_w"], (2, 3, 1, 0))      # (2, 2, 128, 768) = [i, j, cin, o]
    w2f = w2t.reshape(P * 128, 768)                           # row = (i*2+j)*128 + cin = p*128 + cin
    w2f = (w2f * params["bn2_scale"][None, :]).astype(jnp.bfloat16)
    o2 = params["bn2_off"].reshape(1, 768)

    wl = params["fc_w"].T.astype(jnp.bfloat16)          # (768, num_classes)
    bl = params["fc_b"].reshape(1, NUM_CLASSES)         # f32

    return pl.pallas_call(
        aux_head_kernel,
        out_shape=jax.ShapeDtypeStruct((N, NUM_CLASSES), jnp.float32),
        grid=(1,),
        in_specs=[
            pl.BlockSpec((P, N, CK), lambda i: (0, 0, 0)),
            pl.BlockSpec((CK, 128), lambda i: (0, 0)),
            pl.BlockSpec((1, 128), lambda i: (0, 0)),
            pl.BlockSpec((P * 128, 768), lambda i: (0, 0)),
            pl.BlockSpec((1, 768), lambda i: (0, 0)),
            pl.BlockSpec((768, NUM_CLASSES), lambda i: (0, 0)),
            pl.BlockSpec((1, NUM_CLASSES), lambda i: (0, 0)),
        ],
        out_specs=pl.BlockSpec((N, NUM_CLASSES), lambda i: (0, 0)),
    )(xw, w1e, o1, w2f, o2, wl, bl)


def init_params(key):
    ks = jax.random.split(key, 14)
    conv1_w = jax.random.normal(ks[0], (128, C, 1, 1), jnp.float32) * 0.1
    conv2_w = jax.random.normal(ks[1], (768, 128, 2, 2), jnp.float32) * 0.05
    fc_w = jax.random.normal(ks[2], (NUM_CLASSES, 768), jnp.float32) * 0.05
    fc_b = jax.random.normal(ks[3], (NUM_CLASSES,), jnp.float32) * 0.1
    # BatchNorm params + running stats (eval mode), folded into scale/offset.
    g1 = jax.random.uniform(ks[4], (128,), minval=0.5, maxval=1.5)
    b1 = jax.random.normal(ks[5], (128,)) * 0.1
    m1 = jax.random.normal(ks[6], (128,)) * 0.1
    v1 = jax.random.uniform(ks[7], (128,), minval=0.5, maxval=1.5)
    g2 = jax.random.uniform(ks[8], (768,), minval=0.5, maxval=1.5)
    b2 = jax.random.normal(ks[9], (768,)) * 0.1
    m2 = jax.random.normal(ks[10], (768,)) * 0.1
    v2 = jax.random.uniform(ks[11], (768,), minval=0.5, maxval=1.5)
    bn1_scale = g1 / jnp.sqrt(v1 + EPS)
    bn1_off = b1 - m1 * bn1_scale
    bn2_scale = g2 / jnp.sqrt(v2 + EPS)
    bn2_off = b2 - m2 * bn2_scale
    return dict(conv1_w=conv1_w, conv2_w=conv2_w, fc_w=fc_w, fc_b=fc_b,
                bn1_scale=bn1_scale, bn1_off=bn1_off,
                bn2_scale=bn2_scale, bn2_off=bn2_off)


def ref_forward(x, p):
    """Pure-JAX f32 reference mirroring the PyTorch forward (eval-mode BN)."""
    h = jax.nn.relu(x)
    pooled = jax.lax.reduce_window(h, 0.0, jax.lax.add,
                                   (1, 1, 5, 5), (1, 1, 3, 3), 'VALID') / 25.0
    y = jax.lax.conv_general_dilated(pooled, p["conv1_w"], (1, 1), 'VALID',
                                     dimension_numbers=('NCHW', 'OIHW', 'NCHW'))
    y = y * p["bn1_scale"][None, :, None, None] + p["bn1_off"][None, :, None, None]
    y = jax.nn.relu(y)
    y = jax.lax.conv_general_dilated(y, p["conv2_w"], (1, 1), 'VALID',
                                     dimension_numbers=('NCHW', 'OIHW', 'NCHW'))
    y = y * p["bn2_scale"][None, :, None, None] + p["bn2_off"][None, :, None, None]
    y = jax.nn.relu(y)
    y = y.reshape(x.shape[0], -1)
    return y @ p["fc_w"].T + p["fc_b"]


if __name__ == "__main__":
    key = jax.random.PRNGKey(0)
    k_x, k_p = jax.random.split(key)
    x = jax.random.normal(k_x, (N, C, H, W), jnp.float32)   # NCHW, matches PyTorch
    params = init_params(k_p)

    out = aux_head_forward(x, params)
    out = jax.block_until_ready(out)

    ref = ref_forward(x, params)
    assert out.shape == (N, NUM_CLASSES), out.shape
    # Tolerance loosened vs. pure-f32 because w2 / fc weights are shipped in bf16
    # (accumulation stays f32, so error stays small).
    assert jnp.allclose(out, ref, atol=2e-2, rtol=2e-2), (
        f"max abs err = {jnp.max(jnp.abs(out - ref))}")
    print("KERNEL_OK")
</pallas_src>

<mosaic_0001>
module attributes {stable_mosaic.version = 11 : i64} {
  func.func @aux_head_kernel(%arg0: i32, %arg1: memref<4x2x100xf32, #tpu.memory_space<vmem>>, %arg2: memref<100x128xf32, #tpu.memory_space<vmem>>, %arg3: memref<1x128xf32, #tpu.memory_space<vmem>>, %arg4: memref<512x768xbf16, #tpu.memory_space<vmem>>, %arg5: memref<1x768xf32, #tpu.memory_space<vmem>>, %arg6: memref<768x10xbf16, #tpu.memory_space<vmem>>, %arg7: memref<1x10xf32, #tpu.memory_space<vmem>>, %arg8: memref<2x10xf32, #tpu.memory_space<vmem>>) attributes {dimension_semantics = [#tpu.dimension_semantics<arbitrary>], iteration_bounds = array<i64: 1>, scalar_prefetch = 0 : i64, scratch_operands = 0 : i64, tpu.core_type = #tpu.core_type<tc>, window_params = [{pipeline_mode = #tpu.pipeline_mode<synchronous>, transform_indices = @transform_0, window_bounds = array<i64: 4, 2, 100>}, {pipeline_mode = #tpu.pipeline_mode<synchronous>, transform_indices = @transform_1, window_bounds = array<i64: 100, 128>}, {pipeline_mode = #tpu.pipeline_mode<synchronous>, transform_indices = @transform_2, window_bounds = array<i64: 1, 128>}, {pipeline_mode = #tpu.pipeline_mode<synchronous>, transform_indices = @transform_3, window_bounds = array<i64: 512, 768>}, {pipeline_mode = #tpu.pipeline_mode<synchronous>, transform_indices = @transform_4, window_bounds = array<i64: 1, 768>}, {pipeline_mode = #tpu.pipeline_mode<synchronous>, transform_indices = @transform_5, window_bounds = array<i64: 768, 10>}, {pipeline_mode = #tpu.pipeline_mode<synchronous>, transform_indices = @transform_6, window_bounds = array<i64: 1, 10>}, {pipeline_mode = #tpu.pipeline_mode<synchronous>, transform_indices = @transform_7, window_bounds = array<i64: 2, 10>}]} {
    %c0 = arith.constant 0 : index
    %c0_0 = arith.constant 0 : index
    %0 = vector.load %arg2[%c0, %c0_0] : memref<100x128xf32, #tpu.memory_space<vmem>>, vector<100x128xf32>
    %c0_1 = arith.constant 0 : index
    %c0_2 = arith.constant 0 : index
    %1 = vector.load %arg3[%c0_1, %c0_2] : memref<1x128xf32, #tpu.memory_space<vmem>>, vector<1x128xf32>
    %c0_3 = arith.constant 0 : index
    %c0_4 = arith.constant 0 : index
    %c0_5 = arith.constant 0 : index
    %2 = vector.load %arg1[%c0_3, %c0_4, %c0_5] : memref<4x2x100xf32, #tpu.memory_space<vmem>>, vector<1x2x100xf32>
    %3 = vector.shape_cast %2 : vector<1x2x100xf32> to vector<2x100xf32>
    %cst = arith.constant 0.000000e+00 : f32
    %4 = vector.broadcast %cst : f32 to vector<2x100xf32>
    %5 = arith.maximumf %3, %4 : vector<2x100xf32>
    %cst_6 = arith.constant dense<0.000000e+00> : vector<2x128xf32>
    %6 = tpu.matmul %5, %0, %cst_6 {dimension_numbers = #tpu.dot_dimension_numbers<[1], [0], [0], [1], [0, 0, 1, 1], [], []>} : vector<2x100xf32>, vector<100x128xf32>, vector<2x128xf32> -> vector<2x128xf32>
    %7 = vector.broadcast %1 : vector<1x128xf32> to vector<2x128xf32>
    %8 = arith.addf %6, %7 : vector<2x128xf32>
    %cst_7 = arith.constant 0.000000e+00 : f32
    %9 = vector.broadcast %cst_7 : f32 to vector<2x128xf32>
    %10 = arith.maximumf %8, %9 : vector<2x128xf32>
    %c1 = arith.constant 1 : index
    %c0_8 = arith.constant 0 : index
    %c0_9 = arith.constant 0 : index
    %11 = vector.load %arg1[%c1, %c0_8, %c0_9] : memref<4x2x100xf32, #tpu.memory_space<vmem>>, vector<1x2x100xf32>
    %12 = vector.shape_cast %11 : vector<1x2x100xf32> to vector<2x100xf32>
    %cst_10 = arith.constant 0.000000e+00 : f32
    %13 = vector.broadcast %cst_10 : f32 to vector<2x100xf32>
    %14 = arith.maximumf %12, %13 : vector<2x100xf32>
    %cst_11 = arith.constant dense<0.000000e+00> : vector<2x128xf32>
    %15 = tpu.matmul %14, %0, %cst_11 {dimension_numbers = #tpu.dot_dimension_numbers<[1], [0], [0], [1], [0, 0, 1, 1], [], []>} : vector<2x100xf32>, vector<100x128xf32>, vector<2x128xf32> -> vector<2x128xf32>
    %16 = vector.broadcast %1 : vector<1x128xf32> to vector<2x128xf32>
    %17 = arith.addf %15, %16 : vector<2x128xf32>
    %cst_12 = arith.constant 0.000000e+00 : f32
    %18 = vector.broadcast %cst_12 : f32 to vector<2x128xf32>
    %19 = arith.maximumf %17, %18 : vector<2x128xf32>
    %c2 = arith.constant 2 : index
    %c0_13 = arith.constant 0 : index
    %c0_14 = arith.constant 0 : index
    %20 = vector.load %arg1[%c2, %c0_13, %c0_14] : memref<4x2x100xf32, #tpu.memory_space<vmem>>, vector<1x2x100xf32>
    %21 = vector.shape_cast %20 : vector<1x2x100xf32> to vector<2x100xf32>
    %cst_15 = arith.constant 0.000000e+00 : f32
    %22 = vector.broadcast %cst_15 : f32 to vector<2x100xf32>
    %23 = arith.maximumf %21, %22 : vector<2x100xf32>
    %cst_16 = arith.constant dense<0.000000e+00> : vector<2x128xf32>
    %24 = tpu.matmul %23, %0, %cst_16 {dimension_numbers = #tpu.dot_dimension_numbers<[1], [0], [0], [1], [0, 0, 1, 1], [], []>} : vector<2x100xf32>, vector<100x128xf32>, vector<2x128xf32> -> vector<2x128xf32>
    %25 = vector.broadcast %1 : vector<1x128xf32> to vector<2x128xf32>
    %26 = arith.addf %24, %25 : vector<2x128xf32>
    %cst_17 = arith.constant 0.000000e+00 : f32
    %27 = vector.broadcast %cst_17 : f32 to vector<2x128xf32>
    %28 = arith.maximumf %26, %27 : vector<2x128xf32>
    %c3 = arith.constant 3 : index
    %c0_18 = arith.constant 0 : index
    %c0_19 = arith.constant 0 : index
    %29 = vector.load %arg1[%c3, %c0_18, %c0_19] : memref<4x2x100xf32, #tpu.memory_space<vmem>>, vector<1x2x100xf32>
    %30 = vector.shape_cast %29 : vector<1x2x100xf32> to vector<2x100xf32>
    %cst_20 = arith.constant 0.000000e+00 : f32
    %31 = vector.broadcast %cst_20 : f32 to vector<2x100xf32>
    %32 = arith.maximumf %30, %31 : vector<2x100xf32>
    %cst_21 = arith.constant dense<0.000000e+00> : vector<2x128xf32>
    %33 = tpu.matmul %32, %0, %cst_21 {dimension_numbers = #tpu.dot_dimension_numbers<[1], [0], [0], [1], [0, 0, 1, 1], [], []>} : vector<2x100xf32>, vector<100x128xf32>, vector<2x128xf32> -> vector<2x128xf32>
    %34 = vector.broadcast %1 : vector<1x128xf32> to vector<2x128xf32>
    %35 = arith.addf %33, %34 : vector<2x128xf32>
    %cst_22 = arith.constant 0.000000e+00 : f32
    %36 = vector.broadcast %cst_22 : f32 to vector<2x128xf32>
    %37 = arith.maximumf %35, %36 : vector<2x128xf32>
    %38 = tpu.concatenate %10, %19, %28, %37 in 1 : vector<2x128xf32>, vector<2x128xf32>, vector<2x128xf32>, vector<2x128xf32> -> vector<2x512xf32>
    %39 = arith.truncf %38 : vector<2x512xf32> to vector<2x512xbf16>
    %c0_23 = arith.constant 0 : index
    %c0_24 = arith.constant 0 : index
    %40 = vector.load %arg4[%c0_23, %c0_24] : memref<512x768xbf16, #tpu.memory_space<vmem>>, vector<512x768xbf16>
    %cst_25 = arith.constant dense<0.000000e+00> : vector<2x768xf32>
    %41 = tpu.matmul %39, %40, %cst_25 {dimension_numbers = #tpu.dot_dimension_numbers<[1], [0], [0], [1], [0, 0, 1, 1], [], []>} : vector<2x512xbf16>, vector<512x768xbf16>, vector<2x768xf32> -> vector<2x768xf32>
    %c0_26 = arith.constant 0 : index
    %c0_27 = arith.constant 0 : index
    %42 = vector.load %arg5[%c0_26, %c0_27] : memref<1x768xf32, #tpu.memory_space<vmem>>, vector<1x768xf32>
    %43 = vector.broadcast %42 : vector<1x768xf32> to vector<2x768xf32>
    %44 = arith.addf %41, %43 : vector<2x768xf32>
    %cst_28 = arith.constant 0.000000e+00 : f32
    %45 = vector.broadcast %cst_28 : f32 to vector<2x768xf32>
    %46 = arith.maximumf %44, %45 : vector<2x768xf32>
    %47 = arith.truncf %46 : vector<2x768xf32> to vector<2x768xbf16>
    %c0_29 = arith.constant 0 : index
    %c0_30 = arith.constant 0 : index
    %48 = vector.load %arg6[%c0_29, %c0_30] : memref<768x10xbf16, #tpu.memory_space<vmem>>, vector<768x10xbf16>
    %cst_31 = arith.constant dense<0.000000e+00> : vector<2x10xf32>
    %49 = tpu.matmul %47, %48, %cst_31 {dimension_numbers = #tpu.dot_dimension_numbers<[1], [0], [0], [1], [0, 0, 1, 1], [], []>} : vector<2x768xbf16>, vector<768x10xbf16>, vector<2x10xf32> -> vector<2x10xf32>
    %c0_32 = arith.constant 0 : index
    %c0_33 = arith.constant 0 : index
    %50 = vector.load %arg7[%c0_32, %c0_33] : memref<1x10xf32, #tpu.memory_space<vmem>>, vector<1x10xf32>
    %51 = vector.broadcast %50 : vector<1x10xf32> to vector<2x10xf32>
    %52 = arith.addf %49, %51 : vector<2x10xf32>
    %c0_34 = arith.constant 0 : index
    %c0_35 = arith.constant 0 : index
    %53 = vector.load %arg8[%c0_34, %c0_35] : memref<2x10xf32, #tpu.memory_space<vmem>>, vector<2x10xf32>
    tpu.vector_store %arg8[%c0_34, %c0_35], %52 {strides = array<i32>} : memref<2x10xf32, #tpu.memory_space<vmem>>, vector<2x10xf32>,
    return
  }
  func.func @transform_0(%arg0: i32) -> (i32, i32, i32) {
    %c0_i32 = arith.constant 0 : i32
    %c0_i32_0 = arith.constant 0 : i32
    %c0_i32_1 = arith.constant 0 : i32
    %c0_i32_2 = arith.constant 0 : i32
    return %c0_i32, %c0_i32_0, %c0_i32_1 : i32, i32, i32
  }
  func.func @transform_1(%arg0: i32) -> (i32, i32) {
    %c0_i32 = arith.constant 0 : i32
    %c0_i32_0 = arith.constant 0 : i32
    %c0_i32_1 = arith.constant 0 : i32
    return %c0_i32, %c0_i32_0 : i32, i32
  }
  func.func @transform_2(%arg0: i32) -> (i32, i32) {
    %c0_i32 = arith.constant 0 : i32
    %c0_i32_0 = arith.constant 0 : i32
    %c0_i32_1 = arith.constant 0 : i32
    return %c0_i32, %c0_i32_0 : i32, i32
  }
  func.func @transform_3(%arg0: i32) -> (i32, i32) {
    %c0_i32 = arith.constant 0 : i32
    %c0_i32_0 = arith.constant 0 : i32
    %c0_i32_1 = arith.constant 0 : i32
    return %c0_i32, %c0_i32_0 : i32, i32
  }
  func.func @transform_4(%arg0: i32) -> (i32, i32) {
    %c0_i32 = arith.constant 0 : i32
    %c0_i32_0 = arith.constant 0 : i32
    %c0_i32_1 = arith.constant 0 : i32
    return %c0_i32, %c0_i32_0 : i32, i32
  }
  func.func @transform_5(%arg0: i32) -> (i32, i32) {
    %c0_i32 = arith.constant 0 : i32
    %c0_i32_0 = arith.constant 0 : i32
    %c0_i32_1 = arith.constant 0 : i32
    return %c0_i32, %c0_i32_0 : i32, i32
  }
  func.func @transform_6(%arg0: i32) -> (i32, i32) {
    %c0_i32 = arith.constant 0 : i32
    %c0_i32_0 = arith.constant 0 : i32
    %c0_i32_1 = arith.constant 0 : i32
    return %c0_i32, %c0_i32_0 : i32, i32
  }
  func.func @transform_7(%arg0: i32) -> (i32, i32) {
    %c0_i32 = arith.constant 0 : i32
    %c0_i32_0 = arith.constant 0 : i32
    %c0_i32_1 = arith.constant 0 : i32
    return %c0_i32, %c0_i32_0 : i32, i32
  }
}

</mosaic_0001>

<bundles_post_ra>
// kernel: tpu_custom_call.1
= control target key start
LH: loop header
LB: loop body
LE: loop exit
PB: predicated region body
PF: predicated region fallthrough
CT: control target
= control target key end

     0   :  { %12 = vsyncpa [#allocation3], 0  ;;  %s3720_s0 = inlined_call_operand.vmem [shape: f32[4,2,100], index: 0, kind: input, shape index: {}]   ;;  %s3721_s1 = inlined_call_operand.vmem [shape: f32[100,128], index: 1, kind: input, shape index: {}]   ;;  %s3722_s2 = inlined_call_operand.vmem [shape: f32[1,128], index: 2, kind: input, shape index: {}]   ;;  %s3723_s3 = inlined_call_operand.hbm [shape: bf16[512,768], index: 3, kind: input, shape index: {}]   ;;  %s3724_s4 = inlined_call_operand.vmem [shape: f32[1,768], index: 4, kind: input, shape index: {}]   ;;  %s3725_s5 = inlined_call_operand.vmem [shape: bf16[768,10], index: 5, kind: input, shape index: {}]   ;;  %s3726_s6 = inlined_call_operand.vmem [shape: f32[1,10], index: 6, kind: input, shape index: {}]   ;;  %s3727_s7 = inlined_call_operand.hbm [shape: f32[2,10], index: 7, kind: output, shape index: {}]  }
   0x1   :  { %13 = vsyncpa [#allocation4], 0  ;;  %s3320_s24 = smov [#allocation2]   ;;  %s3272_s28 = scalar_lea.hbm %s3723_s3, 24576 }
   0x2   :  { %s25_s25 = sshll.u32 %s3320_s24, 4  ;;  %p3273_p0 = scmp.ne.s32.totalorder %s3723_s3, %s3272_s28  ;;  %s26_s25 = int_to_ptr.vmem [resolvable:$true] %s25_s25 }
   0x3   :  { %p3276_p1 = scmp.lt.u32.totalorder %s3272_s28, %s3723_s3 }
   0x5   :  { %p3278_p2 = pnand %p3276_p1, %p3273_p0 }
   0x7   :  { %3281 = shalt.err (!%p3278_p2)
}
   0x8   :  { %s3282_s10 = scalar_lea.vmem %s26_s25, 24576  ;;  %p3287_p4 = scmp.lt.s32.totalorder %s26_s25, %s26_s25 }
   0x9   :  { %p3283_p3 = scmp.ne.s32.totalorder %s26_s25, %s3282_s10  ;;  %p3288_p5 = scmp.lt.s32.totalorder %s3282_s10, %s3282_s10 }
   0xb   :  { %p3289_p6 = por %p3288_p5, %p3287_p4 }
   0xd   :  { %p3290_p7 = pnand %p3289_p6, %p3283_p3 }
   0xf   :  { %3293 = shalt.err (!%p3290_p7)
}
  0x10   :  { %s3321_s11 = smov 384   ;;  %s3322_s12 = smov 24  }
  0x11   :  { %31 = dma.hbm_to_vmem [thread:$0]  %s3723_s3, 24576, %s26_s25, [#allocation3], %s3321_s11, %s3321_s11, %s3322_s12  }
  0x12   :  { %3316 = dma.done.wait [#allocation3], 24576  }
  0x13   :  { %3317 = vsyncadd [#allocation3], 4294942720  ;;  %v3323_v0 = vmov 0.0|0.0   ;;  %vm3324_vm0 = vmmov 0   ;;  %v3325_v1 = vmov 0.0   ;;  %v42_v2 = vld [vmem:[%s3721_s1] sm:$0xff] }
  0x14   :  { %2839 = vmatprep.subr.bf16.mxu1 %v3323_v0  ;;  %2749 = vmatprep.mubr.msk.f32.mxu1 %vm3324_vm0, %v3325_v1  ;;  %v43_v3 = vld [vmem:[%s3721_s1 + $0x8] sm:$0xff]  ;;  %v44_v4 = vld [vmem:[%s3721_s1 + $0x10] sm:$0xff]  ;;  %v45_v6 = vld [vmem:[%s3721_s1 + $0x18] sm:$0xff]  ;;  %vm68_vm1 = vcmask 1043456   ;;  %vm64_vm2 = vcmask 818176   ;;  %s3326_s15 = smov [#allocation5]  }
  0x15   :  { %2875 = vmatprep.subr.bf16.mxu0 %v3323_v0  ;;  %2807 = vmatprep.mubr.msk.f32.mxu0 %vm3324_vm0, %v3325_v1  ;;  %v3394_v5 = vpack.c.bf16 %v43_v3, %v42_v2  ;;  %v3400_v7 = vpack.c.bf16 %v45_v6, %v44_v4  ;;  %v46_v8 = vld [vmem:[%s3721_s1 + $0x20] sm:$0xff]  ;;  %v47_v9 = vld [vmem:[%s3721_s1 + $0x28] sm:$0xff]  ;;  %v48_v11 = vld [vmem:[%s3721_s1 + $0x30] sm:$0xff]  ;;  %s2339_s16 = sshll.u32 %s3326_s15, 4  ;;  %vm2331_vm3 = vcmask 74752   ;;  %s2340_s16 = int_to_ptr.vmem [resolvable:$true] %s2339_s16 }
  0x16   :  { %v3412_v10 = vpack.c.bf16 %v47_v9, %v46_v8  ;;  %v49_v12 = vld [vmem:[%s3721_s1 + $0x38] sm:$0xff]  ;;  %v50_v14 = vld [vmem:[%s3721_s1 + $0x40] sm:$0xff]  ;;  %v51_v15 = vld [vmem:[%s3721_s1 + $0x48] sm:$0xff]  ;;  %s3294_s3 = scalar_lea.vmem %s2340_s16, 32  ;;  %p3299_p9 = scmp.lt.s32.totalorder %s2340_s16, %s2340_s16 }
  0x17   :  { %2841 = vmatpush3.bf16.msra.mxu1 %v3394_v5  ;;  %2877 = vmatpush3.bf16.msra.mxu0 %v3394_v5  ;;  %v3424_v13 = vpack.c.bf16 %v49_v12, %v48_v11  ;;  %v3436_v16 = vpack.c.bf16 %v51_v15, %v50_v14  ;;  %v52_v17 = vld [vmem:[%s3721_s1 + $0x50] sm:$0xff]  ;;  %v53_v18 = vld [vmem:[%s3721_s1 + $0x58] sm:$0xff]  ;;  %v56_v20 = vld [vmem:[%s3720_s0] sm:$0x3]  ;;  %p3295_p8 = scmp.ne.s32.totalorder %s2340_s16, %s3294_s3  ;;  %p3300_p10 = scmp.lt.s32.totalorder %s3294_s3, %s3294_s3 }
  0x18   :  { %2842 = vmatprep.subr.bf16.mxu1 %v3323_v0  ;;  %2878 = vmatprep.subr.bf16.mxu0 %v3323_v0  ;;  %v3448_v19 = vpack.c.bf16 %v53_v18, %v52_v17  ;;  %v2354_v21 = vld [vmem:[%s3720_s0 + $0x4] sm:$0x3]  ;;  %v3465_v22 = vld [vmem:[%s3721_s1 + $0x60] sm:$0xf]  ;;  %v57_v23 = vmax.f32 %v56_v20, 0.0 }
  0x19   :  { %v222_v24 = vmax.f32 %v2354_v21, 0.0  ;;  %v2936_v25 = vld [vmem:[#allocation2] ss:$24 sps:$4 sm:$0xff]   ;;  %v2938_v26 = vld [vmem:[#allocation2 + $0x4] ss:$24 sps:$4 sm:$0xff]   ;;  %p3301_p11 = por %p3300_p10, %p3299_p9 }
  0x1a   :  { %v2944_v27 = vld [vmem:[#allocation2 + $0x34] ss:$24 sps:$4 sm:$0xff]   ;;  %v2942_v28 = vld [vmem:[#allocation2 + $0x30] ss:$24 sps:$4 sm:$0xff]   ;;  %v2950_v29 = vld [vmem:[#allocation2 + $0x64] ss:$24 sps:$4 sm:$0xff]  }
  0x1b   :  { %2844 = vmatpush3.bf16.msra.mxu1 %v3400_v7  ;;  %2880 = vmatpush3.bf16.msra.mxu0 %v3400_v7  ;;  %v2948_v30 = vld [vmem:[#allocation2 + $0x60] ss:$24 sps:$4 sm:$0xff]   ;;  %v2956_v31 = vld [vmem:[#allocation2 + $0x94] ss:$24 sps:$4 sm:$0xff]   ;;  %v2954_v32 = vld [vmem:[#allocation2 + $0x90] ss:$24 sps:$4 sm:$0xff]   ;;  %p3302_p12 = pnand %p3301_p11, %p3295_p8 }
  0x1c   :  { %2845 = vmatprep.subr.bf16.mxu1 %v3323_v0  ;;  %2881 = vmatprep.subr.bf16.mxu0 %v3323_v0  ;;  %v2962_v33 = vld [vmem:[#allocation2 + $0xc4] ss:$24 sps:$4 sm:$0xff]   ;;  %v2960_v34 = vld [vmem:[#allocation2 + $0xc0] ss:$24 sps:$4 sm:$0xff]   ;;  %v2968_v35 = vld [vmem:[#allocation2 + $0xf4] ss:$24 sps:$4 sm:$0xff]  }
  0x1d   :  { %v2351_v36 = vld [vmem:[%s3720_s0 + $0x2] sm:$0x3]  ;;  %v2966_v37 = vld [vmem:[#allocation2 + $0xf0] ss:$24 sps:$4 sm:$0xff]   ;;  %v2974_v38 = vld [vmem:[#allocation2 + $0x124] ss:$24 sps:$4 sm:$0xff]  }
  0x1e   :  { %v145_v39 = vmax.f32 %v2351_v36, 0.0  ;;  %v2972_v40 = vld [vmem:[#allocation2 + $0x120] ss:$24 sps:$4 sm:$0xff]   ;;  %v2980_v41 = vld [vmem:[#allocation2 + $0x154] ss:$24 sps:$4 sm:$0xff]  }
  0x1f   :  { %2847 = vmatpush3.bf16.msra.mxu1 %v3412_v10  ;;  %2883 = vmatpush3.bf16.msra.mxu0 %v3412_v10  ;;  %v2978_v42 = vld [vmem:[#allocation2 + $0x150] ss:$24 sps:$4 sm:$0xff]   ;;  %v2357_v43 = vld [vmem:[%s3720_s0 + $0x6] sm:$0x3]  ;;  %v2947_v47 = vld [vmem:[#allocation2 + $0x3c] ss:$24 sps:$4 sm:$0xff]  }
  0x20   :  { %2848 = vmatprep.subr.bf16.mxu1 %v3323_v0  ;;  %2884 = vmatprep.subr.bf16.mxu0 %v3323_v0  ;;  %v2941_v44 = vld [vmem:[#allocation2 + $0xc] ss:$24 sps:$4 sm:$0xff]   ;;  %v2939_v45 = vld [vmem:[#allocation2 + $0x8] ss:$24 sps:$4 sm:$0xff]   ;;  %v299_v46 = vmax.f32 %v2357_v43, 0.0 }
  0x21   :  { %v2945_v48 = vld [vmem:[#allocation2 + $0x38] ss:$24 sps:$4 sm:$0xff]   ;;  %v2953_v49 = vld [vmem:[#allocation2 + $0x6c] ss:$24 sps:$4 sm:$0xff]   ;;  %v2951_v50 = vld [vmem:[#allocation2 + $0x68] ss:$24 sps:$4 sm:$0xff]  }
  0x22   :  { %v2959_v51 = vld [vmem:[#allocation2 + $0x9c] ss:$24 sps:$4 sm:$0xff]   ;;  %v2957_v52 = vld [vmem:[#allocation2 + $0x98] ss:$24 sps:$4 sm:$0xff]   ;;  %v2965_v53 = vld [vmem:[#allocation2 + $0xcc] ss:$24 sps:$4 sm:$0xff]  }
  0x23   :  { %2850 = vmatpush3.bf16.msra.mxu1 %v3424_v13  ;;  %2886 = vmatpush3.bf16.msra.mxu0 %v3424_v13  ;;  %v2963_v54 = vld [vmem:[#allocation2 + $0xc8] ss:$24 sps:$4 sm:$0xff]   ;;  %v2971_v55 = vld [vmem:[#allocation2 + $0xfc] ss:$24 sps:$4 sm:$0xff]   ;;  %v2969_v56 = vld [vmem:[#allocation2 + $0xf8] ss:$24 sps:$4 sm:$0xff]  }
  0x24   :  { %2851 = vmatprep.subr.bf16.mxu1 %v3323_v0  ;;  %2887 = vmatprep.subr.bf16.mxu0 %v3323_v0  ;;  %v2977_v57 = vld [vmem:[#allocation2 + $0x12c] ss:$24 sps:$4 sm:$0xff]   ;;  %v2975_v58 = vld [vmem:[#allocation2 + $0x128] ss:$24 sps:$4 sm:$0xff]   ;;  %v2983_v59 = vld [vmem:[#allocation2 + $0x15c] ss:$24 sps:$4 sm:$0xff]  }
  0x25   :  { %v2981_v60 = vld [vmem:[#allocation2 + $0x158] ss:$24 sps:$4 sm:$0xff]   ;;  %v2986_v61 = vld [vmem:[#allocation2 + $0x184] ss:$24 sps:$4 sm:$0xff]   ;;  %v3004_v9 = vld [vmem:[#allocation2 + $0x214] ss:$24 sps:$4 sm:$0xff]  }
  0x26   :  { %v2989_v62 = vld [vmem:[#allocation2 + $0x18c] ss:$24 sps:$4 sm:$0xff]   ;;  %v2984_v63 = vld [vmem:[#allocation2 + $0x180] ss:$24 sps:$4 sm:$0xff]   ;;  %v2995_v2 = vld [vmem:[#allocation2 + $0x1bc] ss:$24 sps:$4 sm:$0xff]  }
  0x27   :  { %2853 = vmatpush3.bf16.msra.mxu1 %v3436_v16  ;;  %2889 = vmatpush3.bf16.msra.mxu0 %v3436_v16  ;;  %v2990_v3 = vld [vmem:[#allocation2 + $0x1b0] ss:$24 sps:$4 sm:$0xff]   ;;  %v2996_v6 = vld [vmem:[#allocation2 + $0x1e0] ss:$24 sps:$4 sm:$0xff]   ;;  %v3001_v8 = vld [vmem:[#allocation2 + $0x1ec] ss:$24 sps:$4 sm:$0xff]  }
  0x28   :  { %2854 = vmatprep.subr.bf16.mxu1 %v3323_v0  ;;  %2890 = vmatprep.subr.bf16.mxu0 %v3323_v0  ;;  %v2993_v4 = vld [vmem:[#allocation2 + $0x1b8] ss:$24 sps:$4 sm:$0xff]   ;;  %v3013_v14 = vld [vmem:[#allocation2 + $0x24c] ss:$24 sps:$4 sm:$0xff]   ;;  %v3019_v18 = vld [vmem:[#allocation2 + $0x27c] ss:$24 sps:$4 sm:$0xff]  }
  0x29   :  { %v3002_v11 = vld [vmem:[#allocation2 + $0x210] ss:$24 sps:$4 sm:$0xff]   ;;  %v3008_v15 = vld [vmem:[#allocation2 + $0x240] ss:$24 sps:$4 sm:$0xff]   ;;  %v3016_v17 = vld [vmem:[#allocation2 + $0x274] ss:$24 sps:$4 sm:$0xff]  }
  0x2a   :  { %v3005_v12 = vld [vmem:[#allocation2 + $0x218] ss:$24 sps:$4 sm:$0xff]   ;;  %v3022_v21 = vld [vmem:[#allocation2 + $0x2a4] ss:$24 sps:$4 sm:$0xff]  }
  0x2b   :  { %2856 = vmatpush3.bf16.msra.mxu1 %v3448_v19  ;;  %2892 = vmatpush3.bf16.msra.mxu0 %v3448_v19  ;;  %v3017_v20 = vld [vmem:[#allocation2 + $0x278] ss:$24 sps:$4 sm:$0xff]  }
  0x2c   :  { %2747 = vmatprep.subr.mxu1 %v3325_v1  ;;  %2805 = vmatprep.subr.mxu0 %v3325_v1 }
  0x2f   :  { %2748 = vmatpush3.msk.msra.mxu1 %vm68_vm1, %v3465_v22  ;;  %2806 = vmatpush3.msk.msra.mxu0 %vm68_vm1, %v3465_v22 }
  0x30   :  { %2750 = vmatmul.mubr.msk.f32.vlgmr.msra.gmra.mrb[0].mxu1 %vm64_vm2, %v57_v23  ;;  %2857 = vmatprep.subr.bf16.mxu1 %v3323_v0  ;;  %v3020_v23 = vld [vmem:[#allocation2 + $0x2a0] ss:$24 sps:$4 sm:$0xff]  }
  0x31   :  { %2859 = vmatpush3.bf16.msra.mxu1 %v3394_v5  ;;  %2778 = vmatprep.mubr.msk.f32.mxu1 %vm3324_vm0, %v3325_v1 }
  0x32   :  { %2860 = vmatprep.subr.bf16.mxu1 %v3323_v0  ;;  %2808 = vmatmul.mubr.msk.f32.vlgmr.msra.gmra.mrb[0].mxu0 %vm64_vm2, %v222_v24  ;;  %v3023_v24 = vld [vmem:[#allocation2 + $0x2a8] ss:$24 sps:$4 sm:$0xff]  }
  0x33   :  { %1562 = vmatprep.subr.bf16.mxu0 %v2938_v26  ;;  %v3031_v26 = vld [vmem:[#allocation2 + $0x2dc] ss:$24 sps:$4 sm:$0xff]  }
  0x34   :  { %1563 = vmatpush1.bf16.msra.mxu0 %v2936_v25  ;;  %v3028_v25 = vld [vmem:[#allocation2 + $0x2d4] ss:$24 sps:$4 sm:$0xff]  }
  0x35   :  { %2862 = vmatpush3.bf16.msra.mxu1 %v3400_v7  ;;  %1564 = vmatprep.subr.bf16.mxu0 %v2944_v27  ;;  %v3026_v27 = vld [vmem:[#allocation2 + $0x2d0] ss:$24 sps:$4 sm:$0xff]  }
  0x36   :  { %2863 = vmatprep.subr.bf16.mxu1 %v3323_v0 }
  0x38   :  { %1565 = vmatpush1.bf16.msra.mxu0 %v2942_v28  ;;  %v3029_v28 = vld [vmem:[#allocation2 + $0x2d8] ss:$24 sps:$4 sm:$0xff]  }
  0x39   :  { %2865 = vmatpush3.bf16.msra.mxu1 %v3412_v10  ;;  %1566 = vmatprep.subr.bf16.mxu0 %v2950_v29  ;;  %v3034_v29 = vld [vmem:[#allocation2 + $0x304] ss:$24 sps:$4 sm:$0xff]  }
  0x3a   :  { %2866 = vmatprep.subr.bf16.mxu1 %v3323_v0 }
  0x3c   :  { %1567 = vmatpush1.bf16.msra.mxu0 %v2948_v30  ;;  %v3037_v30 = vld [vmem:[#allocation2 + $0x30c] ss:$24 sps:$4 sm:$0xff]  }
  0x3d   :  { %2868 = vmatpush3.bf16.msra.mxu1 %v3424_v13  ;;  %1568 = vmatprep.subr.bf16.mxu0 %v2956_v31 }
  0x3e   :  { %2869 = vmatprep.subr.bf16.mxu1 %v3323_v0 }
  0x40   :  { %1569 = vmatpush1.bf16.msra.mxu0 %v2954_v32 }
  0x41   :  { %2871 = vmatpush3.bf16.msra.mxu1 %v3436_v16  ;;  %1570 = vmatprep.subr.bf16.mxu0 %v2962_v33  ;;  %v2348_v33 = vld [vmem:[%s3722_s2] ss:$0 sm:$0xff] }
  0x42   :  { %2872 = vmatprep.subr.bf16.mxu1 %v3323_v0 }
  0x44   :  { %1571 = vmatpush1.bf16.msra.mxu0 %v2960_v34 }
  0x45   :  { %2874 = vmatpush3.bf16.msra.mxu1 %v3448_v19  ;;  %1572 = vmatprep.subr.bf16.mxu0 %v2968_v35 }
  0x46   :  { %2776 = vmatprep.subr.mxu1 %v3325_v1 }
  0x48   :  { %1573 = vmatpush1.bf16.msra.mxu0 %v2966_v37 }
  0x49   :  { %2777 = vmatpush3.msk.msra.mxu1 %vm68_vm1, %v3465_v22  ;;  %1574 = vmatprep.subr.bf16.mxu0 %v2974_v38 }
  0x4a   :  { %2779 = vmatmul.mubr.msk.f32.vlgmr.msra.gmra.mrb[2].mxu1 %vm64_vm2, %v145_v39  ;;  %2893 = vmatprep.subr.bf16.mxu1 %v3323_v0 }
  0x4b   :  { %2895 = vmatpush3.bf16.msra.mxu1 %v3394_v5  ;;  %2836 = vmatprep.mubr.msk.f32.mxu1 %vm3324_vm0, %v3325_v1  ;;  %v2998_v5 = vld [vmem:[#allocation2 + $0x1e4] ss:$24 sps:$4 sm:$0xff]  }
  0x4c   :  { %2896 = vmatprep.subr.bf16.mxu1 %v3323_v0  ;;  %1575 = vmatpush1.bf16.msra.mxu0 %v2972_v40 }
  0x4d   :  { %1576 = vmatprep.subr.bf16.mxu0 %v2980_v41 }
  0x4f   :  { %2898 = vmatpush3.bf16.msra.mxu1 %v3400_v7  ;;  %v2999_v7 = vld [vmem:[#allocation2 + $0x1e8] ss:$24 sps:$4 sm:$0xff]  }
  0x50   :  { %2899 = vmatprep.subr.bf16.mxu1 %v3323_v0  ;;  %1577 = vmatpush1.bf16.msra.mxu0 %v2978_v42 }
  0x51   :  { %1578 = vmatprep.subr.bf16.mxu0 %v2986_v61  ;;  %v3056_v61 = vld [vmem:[#allocation2 + $0x3c0] ss:$24 sps:$4 sm:$0xff]  }
  0x53   :  { %2901 = vmatpush3.bf16.msra.mxu1 %v3412_v10  ;;  %v3007_v10 = vld [vmem:[#allocation2 + $0x21c] ss:$24 sps:$4 sm:$0xff]  }
  0x54   :  { %2902 = vmatprep.subr.bf16.mxu1 %v3323_v0  ;;  %1579 = vmatpush1.bf16.msra.mxu0 %v2984_v63  ;;  %v3064_v63 = vld [vmem:[#allocation2 + $0x3f4] ss:$24 sps:$4 sm:$0xff]  }
  0x57   :  { %2904 = vmatpush3.bf16.msra.mxu1 %v3424_v13  ;;  %v3010_v13 = vld [vmem:[#allocation2 + $0x244] ss:$24 sps:$4 sm:$0xff]  }
  0x58   :  { %2905 = vmatprep.subr.bf16.mxu1 %v3323_v0 }
  0x5b   :  { %2907 = vmatpush3.bf16.msra.mxu1 %v3436_v16  ;;  %v3011_v16 = vld [vmem:[#allocation2 + $0x248] ss:$24 sps:$4 sm:$0xff]  }
  0x5c   :  { %2908 = vmatprep.subr.bf16.mxu1 %v3323_v0  ;;  %v2987_v0 = vld [vmem:[#allocation2 + $0x188] ss:$24 sps:$4 sm:$0xff]  }
  0x5f   :  { %2910 = vmatpush3.bf16.msra.mxu1 %v3448_v19  ;;  %v3014_v19 = vld [vmem:[#allocation2 + $0x270] ss:$24 sps:$4 sm:$0xff]  }
  0x60   :  { %2834 = vmatprep.subr.mxu1 %v3325_v1  ;;  %v2992_v1 = vld [vmem:[#allocation2 + $0x1b4] ss:$24 sps:$4 sm:$0xff]  }
  0x61   :  { %1580 = vmatprep.subr.bf16.mxu0 %v2992_v1  ;;  %v3062_v1 = vld [vmem:[#allocation2 + $0x3f0] ss:$24 sps:$4 sm:$0xff]  }
  0x62   :  { %1581 = vmatpush1.bf16.msra.mxu0 %v2990_v3  ;;  %v3070_v3 = vld [vmem:[#allocation2 + $0x424] ss:$24 sps:$4 sm:$0xff]  }
  0x63   :  { %2835 = vmatpush3.msk.msra.mxu1 %vm68_vm1, %v3465_v22  ;;  %1582 = vmatprep.subr.bf16.mxu0 %v2998_v5  ;;  %v3025_v22 = vld [vmem:[#allocation2 + $0x2ac] ss:$24 sps:$4 sm:$0xff]  }
  0x64   :  { %2837 = vmatmul.mubr.msk.f32.vlgmr.msra.gmra.mrb[4].mxu1 %vm64_vm2, %v299_v46  ;;  %1644 = vmatprep.subr.bf16.mxu1 %v2941_v44  ;;  %v3032_v44 = vld [vmem:[#allocation2 + $0x300] ss:$24 sps:$4 sm:$0xff]  }
  0x65   :  { %1645 = vmatpush1.bf16.msra.mxu1 %v2939_v45  ;;  %v3035_v45 = vld [vmem:[#allocation2 + $0x308] ss:$24 sps:$4 sm:$0xff]  }
  0x66   :  { %1646 = vmatprep.subr.bf16.mxu1 %v2947_v47  ;;  %1583 = vmatpush1.bf16.msra.mxu0 %v2996_v6  ;;  %v3040_v47 = vld [vmem:[#allocation2 + $0x334] ss:$24 sps:$4 sm:$0xff]  }
  0x67   :  { %1584 = vmatprep.subr.bf16.mxu0 %v3004_v9  ;;  %v3071_v9 = vld [vmem:[#allocation2 + $0x428] ss:$24 sps:$4 sm:$0xff]  }
  0x69   :  { %1647 = vmatpush1.bf16.msra.mxu1 %v2945_v48  ;;  %v3043_v48 = vld [vmem:[#allocation2 + $0x33c] ss:$24 sps:$4 sm:$0xff]  }
  0x6a   :  { %1648 = vmatprep.subr.bf16.mxu1 %v2953_v49  ;;  %1585 = vmatpush1.bf16.msra.mxu0 %v3002_v11  ;;  %v3038_v49 = vld [vmem:[#allocation2 + $0x330] ss:$24 sps:$4 sm:$0xff]   ;;  %v3076_v11 = vld [vmem:[#allocation2 + $0x454] ss:$24 sps:$4 sm:$0xff]  }
  0x6b   :  { %1586 = vmatprep.subr.bf16.mxu0 %v3010_v13 }
  0x6d   :  { %1649 = vmatpush1.bf16.msra.mxu1 %v2951_v50  ;;  %v3041_v50 = vld [vmem:[#allocation2 + $0x338] ss:$24 sps:$4 sm:$0xff]  }
  0x6e   :  { %1650 = vmatprep.subr.bf16.mxu1 %v2959_v51  ;;  %1587 = vmatpush1.bf16.msra.mxu0 %v3008_v15  ;;  %v3046_v51 = vld [vmem:[#allocation2 + $0x364] ss:$24 sps:$4 sm:$0xff]   ;;  %v3077_v15 = vld [vmem:[#allocation2 + $0x458] ss:$24 sps:$4 sm:$0xff]  }
  0x6f   :  { %1588 = vmatprep.subr.bf16.mxu0 %v3016_v17  ;;  %v3085_v17 = vld [vmem:[#allocation2 + $0x48c] ss:$24 sps:$4 sm:$0xff]  }
  0x71   :  { %1651 = vmatpush1.bf16.msra.mxu1 %v2957_v52  ;;  %v3049_v52 = vld [vmem:[#allocation2 + $0x36c] ss:$24 sps:$4 sm:$0xff]  }
  0x72   :  { %1652 = vmatprep.subr.bf16.mxu1 %v2965_v53  ;;  %1589 = vmatpush1.bf16.msra.mxu0 %v3014_v19  ;;  %v3044_v53 = vld [vmem:[#allocation2 + $0x360] ss:$24 sps:$4 sm:$0xff]  }
  0x73   :  { %1590 = vmatprep.subr.bf16.mxu0 %v3022_v21  ;;  %v3083_v19 = vld [vmem:[#allocation2 + $0x488] ss:$24 sps:$4 sm:$0xff]   ;;  %v3091_v21 = vld [vmem:[#allocation2 + $0x4bc] ss:$24 sps:$4 sm:$0xff]  }
  0x75   :  { %1653 = vmatpush1.bf16.msra.mxu1 %v2963_v54  ;;  %v3047_v54 = vld [vmem:[#allocation2 + $0x368] ss:$24 sps:$4 sm:$0xff]  }
  0x76   :  { %1654 = vmatprep.subr.bf16.mxu1 %v2971_v55  ;;  %1591 = vmatpush1.bf16.msra.mxu0 %v3020_v23  ;;  %v3052_v55 = vld [vmem:[#allocation2 + $0x394] ss:$24 sps:$4 sm:$0xff]   ;;  %v3089_v23 = vld [vmem:[#allocation2 + $0x4b8] ss:$24 sps:$4 sm:$0xff]  }
  0x77   :  { %1592 = vmatprep.subr.bf16.mxu0 %v3028_v25  ;;  %v3097_v25 = vld [vmem:[#allocation2 + $0x4ec] ss:$24 sps:$4 sm:$0xff]  }
  0x79   :  { %1655 = vmatpush1.bf16.msra.mxu1 %v2969_v56  ;;  %v3055_v56 = vld [vmem:[#allocation2 + $0x39c] ss:$24 sps:$4 sm:$0xff]  }
  0x7a   :  { %1656 = vmatprep.subr.bf16.mxu1 %v2977_v57  ;;  %1593 = vmatpush1.bf16.msra.mxu0 %v3026_v27  ;;  %v3050_v57 = vld [vmem:[#allocation2 + $0x390] ss:$24 sps:$4 sm:$0xff]  }
  0x7b   :  { %1603 = vmatprep.subr.bf16.mxu0 %v3034_v29  ;;  %v3095_v27 = vld [vmem:[#allocation2 + $0x4e8] ss:$24 sps:$4 sm:$0xff]   ;;  %v3103_v29 = vld [vmem:[#allocation2 + $0x51c] ss:$24 sps:$4 sm:$0xff]  }
  0x7d   :  { %1657 = vmatpush1.bf16.msra.mxu1 %v2975_v58  ;;  %v3053_v58 = vld [vmem:[#allocation2 + $0x398] ss:$24 sps:$4 sm:$0xff]  }
  0x7e   :  { %1658 = vmatprep.subr.bf16.mxu1 %v2983_v59  ;;  %v3058_v59 = vld [vmem:[#allocation2 + $0x3c4] ss:$24 sps:$4 sm:$0xff]  }
  0x81   :  { %1659 = vmatpush1.bf16.msra.mxu1 %v2981_v60  ;;  %v3061_v60 = vld [vmem:[#allocation2 + $0x3cc] ss:$24 sps:$4 sm:$0xff]  }
  0x82   :  { %1660 = vmatprep.subr.bf16.mxu1 %v2989_v62  ;;  %v3059_v62 = vld [vmem:[#allocation2 + $0x3c8] ss:$24 sps:$4 sm:$0xff]  }
  0x85   :  { %1661 = vmatpush1.bf16.msra.mxu1 %v2987_v0  ;;  %v3067_v0 = vld [vmem:[#allocation2 + $0x3fc] ss:$24 sps:$4 sm:$0xff]  }
  0x86   :  { %1662 = vmatprep.subr.bf16.mxu1 %v2995_v2  ;;  %v3065_v2 = vld [vmem:[#allocation2 + $0x3f8] ss:$24 sps:$4 sm:$0xff]  }
  0x89   :  { %1663 = vmatpush1.bf16.msra.mxu1 %v2993_v4  ;;  %v3073_v4 = vld [vmem:[#allocation2 + $0x42c] ss:$24 sps:$4 sm:$0xff]  }
  0x8a   :  { %1664 = vmatprep.subr.bf16.mxu1 %v3001_v8  ;;  %v3068_v8 = vld [vmem:[#allocation2 + $0x420] ss:$24 sps:$4 sm:$0xff]  }
  0x8d   :  { %1665 = vmatpush1.bf16.msra.mxu1 %v2999_v7 }
  0x8e   :  { %1666 = vmatprep.subr.bf16.mxu1 %v3007_v10 }
  0x91   :  { %1667 = vmatpush1.bf16.msra.mxu1 %v3005_v12  ;;  %v3079_v12 = vld [vmem:[#allocation2 + $0x45c] ss:$24 sps:$4 sm:$0xff]  }
  0x92   :  { %1668 = vmatprep.subr.bf16.mxu1 %v3013_v14  ;;  %v3074_v14 = vld [vmem:[#allocation2 + $0x450] ss:$24 sps:$4 sm:$0xff]  }
  0x95   :  { %1669 = vmatpush1.bf16.msra.mxu1 %v3011_v16  ;;  %v3082_v16 = vld [vmem:[#allocation2 + $0x484] ss:$24 sps:$4 sm:$0xff]  }
  0x96   :  { %1670 = vmatprep.subr.bf16.mxu1 %v3019_v18  ;;  %v3080_v18 = vld [vmem:[#allocation2 + $0x480] ss:$24 sps:$4 sm:$0xff]  }
  0x99   :  { %1671 = vmatpush1.bf16.msra.mxu1 %v3017_v20  ;;  %v3088_v20 = vld [vmem:[#allocation2 + $0x4b4] ss:$24 sps:$4 sm:$0xff]  }
  0x9a   :  { %1672 = vmatprep.subr.bf16.mxu1 %v3025_v22  ;;  %v3086_v22 = vld [vmem:[#allocation2 + $0x4b0] ss:$24 sps:$4 sm:$0xff]  }
  0x9d   :  { %1673 = vmatpush1.bf16.msra.mxu1 %v3023_v24  ;;  %v3094_v24 = vld [vmem:[#allocation2 + $0x4e4] ss:$24 sps:$4 sm:$0xff]  }
  0x9e   :  { %1674 = vmatprep.subr.bf16.mxu1 %v3031_v26  ;;  %v3092_v26 = vld [vmem:[#allocation2 + $0x4e0] ss:$24 sps:$4 sm:$0xff]  }
  0xa1   :  { %1675 = vmatpush1.bf16.msra.mxu1 %v3029_v28  ;;  %v3100_v28 = vld [vmem:[#allocation2 + $0x514] ss:$24 sps:$4 sm:$0xff]  }
  0xa2   :  { %1685 = vmatprep.subr.bf16.mxu1 %v3037_v30  ;;  %v3098_v30 = vld [vmem:[#allocation2 + $0x510] ss:$24 sps:$4 sm:$0xff]  }
 0x103   :  { %v138_v31 = vpop.f32.mrb[0].mxu1 }
 0x104   :  { %v2751_v32 = vpop.f32.mrb[1].mxu1  ;;  %v139_v37 = vadd.f32 %v2348_v33, %v138_v31  ;;  %v3101_v31 = vld [vmem:[#allocation2 + $0x518] ss:$24 sps:$4 sm:$0xff]  }
 0x105   :  { %v292_v34 = vpop.f32.mrb[0].mxu0  ;;  %v3106_v32 = vld [vmem:[#allocation2 + $0x544] ss:$24 sps:$4 sm:$0xff]  }
 0x106   :  { %v3519_v35 = vadd.f32 %v2348_v33, %v292_v34  ;;  %v2809_v36 = vpop.f32.mrb[1].mxu0  ;;  %v142_v41 = vmax.f32 %v139_v37, 0.0  ;;  %v3104_v34 = vld [vmem:[#allocation2 + $0x540] ss:$24 sps:$4 sm:$0xff]   ;;  %v3112_v37 = vld [vmem:[#allocation2 + $0x574] ss:$24 sps:$4 sm:$0xff]  }
 0x107   :  { %v3107_v36 = vld [vmem:[#allocation2 + $0x548] ss:$24 sps:$4 sm:$0xff]  }
 0x108   :  { %v3523_v46 = vpack.c.bf16 %v142_v41, %v142_v41  ;;  %v3118_v41 = vld [vmem:[#allocation2 + $0x5a4] ss:$24 sps:$4 sm:$0xff]  }
 0x11d   :  { %v215_v38 = vpop.f32.mrb[2].mxu1 }
 0x11e   :  { %v216_v39 = vadd.f32 %v2348_v33, %v215_v38  ;;  %v2780_v40 = vpop.f32.mrb[3].mxu1  ;;  %v3115_v38 = vld [vmem:[#allocation2 + $0x57c] ss:$24 sps:$4 sm:$0xff]  }
 0x11f   :  { %v3113_v40 = vld [vmem:[#allocation2 + $0x578] ss:$24 sps:$4 sm:$0xff]  }
 0x120   :  { %v219_v42 = vmax.f32 %v216_v39, 0.0  ;;  %v3110_v39 = vld [vmem:[#allocation2 + $0x570] ss:$24 sps:$4 sm:$0xff]  }
 0x122   :  { %v3521_v43 = vpack.c.bf16 %v219_v42, %v219_v42  ;;  %v3121_v42 = vld [vmem:[#allocation2 + $0x5ac] ss:$24 sps:$4 sm:$0xff]  }
 0x124   :  { %1594 = vmatprep.mubr.bf16.mxu0 %v3521_v43  ;;  %1676 = vmatprep.mubr.bf16.mxu1 %v3521_v43 }
 0x125   :  { %1595 = vmatmul.mubr.bf16.vlgmr.msra.gmra.mrb[4].mxu0 %v3523_v46  ;;  %1677 = vmatmul.mubr.bf16.vlgmr.msra.gmra.mrb[8].mxu1 %v3523_v46 }
 0x126   :  { %1604 = vmatpush1.bf16.msra.mxu0 %v3032_v44  ;;  %1686 = vmatpush1.bf16.msra.mxu1 %v3035_v45  ;;  %v3116_v44 = vld [vmem:[#allocation2 + $0x5a0] ss:$24 sps:$4 sm:$0xff]  }
 0x127   :  { %1605 = vmatprep.subr.bf16.mxu0 %v3040_v47  ;;  %1687 = vmatprep.subr.bf16.mxu1 %v3043_v48  ;;  %v3119_v45 = vld [vmem:[#allocation2 + $0x5a8] ss:$24 sps:$4 sm:$0xff]   ;;  %v3124_v47 = vld [vmem:[#allocation2 + $0x5d4] ss:$24 sps:$4 sm:$0xff]  }
 0x128   :  { %v3127_v48 = vld [vmem:[#allocation2 + $0x5dc] ss:$24 sps:$4 sm:$0xff]  }
 0x12a   :  { %1606 = vmatpush1.bf16.msra.mxu0 %v3038_v49  ;;  %1688 = vmatpush1.bf16.msra.mxu1 %v3041_v50  ;;  %v296_v49 = vmax.f32 %v3519_v35, 0.0  ;;  %v3122_v50 = vld [vmem:[#allocation2 + $0x5d0] ss:$24 sps:$4 sm:$0xff]   ;;  %v3224_v35 = vld [vmem:[%s3725_s5 + $0x40] sm:$0xff]  }
 0x12b   :  { %1607 = vmatprep.subr.bf16.mxu0 %v3046_v51  ;;  %1689 = vmatprep.subr.bf16.mxu1 %v3049_v52  ;;  %v3125_v51 = vld [vmem:[#allocation2 + $0x5d8] ss:$24 sps:$4 sm:$0xff]   ;;  %v3130_v52 = vld [vmem:[#allocation2 + $0x14] ss:$24 sps:$4 sm:$0xff]  }
 0x12e   :  { %1608 = vmatpush1.bf16.msra.mxu0 %v3044_v53  ;;  %1690 = vmatpush1.bf16.msra.mxu1 %v3047_v54  ;;  %v3534_v53 = vpack.c.bf16 %v296_v49, %v296_v49  ;;  %v3128_v54 = vld [vmem:[#allocation2 + $0x10] ss:$24 sps:$4 sm:$0xff]   ;;  %v3238_v49 = vld [vmem:[%s3725_s5 + $0x78] sm:$0xff]  }
 0x12f   :  { %1609 = vmatprep.subr.bf16.mxu0 %v3052_v55  ;;  %1691 = vmatprep.subr.bf16.mxu1 %v3055_v56  ;;  %v3133_v55 = vld [vmem:[#allocation2 + $0x44] ss:$24 sps:$4 sm:$0xff]  }
 0x130   :  { %v3225_v56 = vld [vmem:[%s3725_s5] sm:$0xff]  }
 0x132   :  { %1610 = vmatpush1.bf16.msra.mxu0 %v3050_v57  ;;  %1692 = vmatpush1.bf16.msra.mxu1 %v3053_v58  ;;  %v3226_v57 = vld [vmem:[%s3725_s5 + $0x48] sm:$0xff]   ;;  %v3131_v58 = vld [vmem:[#allocation2 + $0x40] ss:$24 sps:$4 sm:$0xff]  }
 0x133   :  { %1611 = vmatprep.subr.bf16.mxu0 %v3058_v59  ;;  %1693 = vmatprep.subr.bf16.mxu1 %v3061_v60  ;;  %v3136_v59 = vld [vmem:[#allocation2 + $0x74] ss:$24 sps:$4 sm:$0xff]  }
 0x134   :  { %v3227_v60 = vld [vmem:[%s3725_s5 + $0x8] sm:$0xff]  }
 0x136   :  { %1612 = vmatpush1.bf16.msra.mxu0 %v3056_v61  ;;  %1694 = vmatpush1.bf16.msra.mxu1 %v3059_v62  ;;  %v3228_v61 = vld [vmem:[%s3725_s5 + $0x50] sm:$0xff]  }
 0x137   :  { %1613 = vmatprep.subr.bf16.mxu0 %v3064_v63  ;;  %1695 = vmatprep.subr.bf16.mxu1 %v3067_v0  ;;  %v369_v5 = vpop.f32.mrb[4].mxu1  ;;  %v3134_v62 = vld [vmem:[#allocation2 + $0x70] ss:$24 sps:$4 sm:$0xff]   ;;  %v3139_v63 = vld [vmem:[#allocation2 + $0xa4] ss:$24 sps:$4 sm:$0xff]  }
 0x138   :  { %v370_v6 = vadd.f32 %v2348_v33, %v369_v5  ;;  %v2838_v7 = vpop.f32.mrb[5].mxu1  ;;  %v3109_v33 = vld [vmem:[#allocation2 + $0x54c] ss:$24 sps:$4 sm:$0xff]   ;;  %v3230_v0 = vld [vmem:[%s3725_s5 + $0x58] sm:$0xff]   ;;  %v3140_v5 = vld [vmem:[#allocation2 + $0xd0] ss:$24 sps:$4 sm:$0xff]  }
 0x139   :  { %v3233_v7 = vld [vmem:[%s3725_s5 + $0x20] sm:$0xff]  }
 0x13a   :  { %1614 = vmatpush1.bf16.msra.mxu0 %v3062_v1  ;;  %1696 = vmatpush1.bf16.msra.mxu1 %v3065_v2  ;;  %v373_v10 = vmax.f32 %v370_v6, 0.0  ;;  %v3137_v1 = vld [vmem:[#allocation2 + $0xa0] ss:$24 sps:$4 sm:$0xff]   ;;  %v3142_v2 = vld [vmem:[#allocation2 + $0xd4] ss:$24 sps:$4 sm:$0xff]  }
 0x13b   :  { %1615 = vmatprep.subr.bf16.mxu0 %v3070_v3  ;;  %1697 = vmatprep.subr.bf16.mxu1 %v3073_v4  ;;  %v3231_v3 = vld [vmem:[%s3725_s5 + $0x18] sm:$0xff]   ;;  %v3232_v4 = vld [vmem:[%s3725_s5 + $0x60] sm:$0xff]  }
 0x13c   :  { %v3529_v13 = vpack.c.bf16 %v373_v10, %v373_v10  ;;  %v3145_v6 = vld [vmem:[#allocation2 + $0x104] ss:$24 sps:$4 sm:$0xff]   ;;  %v3148_v10 = vld [vmem:[#allocation2 + $0x134] ss:$24 sps:$4 sm:$0xff]  }
 0x13e   :  { %1616 = vmatpush1.bf16.msra.mxu0 %v3068_v8  ;;  %1698 = vmatpush1.bf16.msra.mxu1 %v3071_v9  ;;  %v3234_v8 = vld [vmem:[%s3725_s5 + $0x68] sm:$0xff]   ;;  %v3143_v9 = vld [vmem:[#allocation2 + $0x100] ss:$24 sps:$4 sm:$0xff]  }
 0x13f   :  { %1617 = vmatprep.subr.bf16.mxu0 %v3076_v11  ;;  %1699 = vmatprep.subr.bf16.mxu1 %v3079_v12  ;;  %v3235_v11 = vld [vmem:[%s3725_s5 + $0x28] sm:$0xff]  }
 0x140   :  { %1635 = vmatprep.mubr.bf16.mxu0 %v3529_v13  ;;  %1717 = vmatprep.mubr.bf16.mxu1 %v3529_v13  ;;  %v3146_v12 = vld [vmem:[#allocation2 + $0x130] ss:$24 sps:$4 sm:$0xff]  }
 0x142   :  { %1618 = vmatpush1.bf16.msra.mxu0 %v3074_v14  ;;  %1700 = vmatpush1.bf16.msra.mxu1 %v3077_v15  ;;  %v3151_v14 = vld [vmem:[#allocation2 + $0x164] ss:$24 sps:$4 sm:$0xff]   ;;  %v3149_v15 = vld [vmem:[#allocation2 + $0x160] ss:$24 sps:$4 sm:$0xff]  }
 0x143   :  { %1619 = vmatprep.subr.bf16.mxu0 %v3082_v16  ;;  %1701 = vmatprep.subr.bf16.mxu1 %v3085_v17  ;;  %v3154_v16 = vld [vmem:[#allocation2 + $0x194] ss:$24 sps:$4 sm:$0xff]   ;;  %v3152_v17 = vld [vmem:[#allocation2 + $0x190] ss:$24 sps:$4 sm:$0xff]  }
 0x146   :  { %1620 = vmatpush1.bf16.msra.mxu0 %v3080_v18  ;;  %1702 = vmatpush1.bf16.msra.mxu1 %v3083_v19  ;;  %v3157_v18 = vld [vmem:[#allocation2 + $0x1c4] ss:$24 sps:$4 sm:$0xff]   ;;  %v3155_v19 = vld [vmem:[#allocation2 + $0x1c0] ss:$24 sps:$4 sm:$0xff]  }
 0x147   :  { %1621 = vmatprep.subr.bf16.mxu0 %v3088_v20  ;;  %1703 = vmatprep.subr.bf16.mxu1 %v3091_v21  ;;  %v3160_v20 = vld [vmem:[#allocation2 + $0x1f4] ss:$24 sps:$4 sm:$0xff]   ;;  %v3158_v21 = vld [vmem:[#allocation2 + $0x1f0] ss:$24 sps:$4 sm:$0xff]  }
 0x14a   :  { %1622 = vmatpush1.bf16.msra.mxu0 %v3086_v22  ;;  %1704 = vmatpush1.bf16.msra.mxu1 %v3089_v23  ;;  %v3163_v22 = vld [vmem:[#allocation2 + $0x224] ss:$24 sps:$4 sm:$0xff]   ;;  %v3161_v23 = vld [vmem:[#allocation2 + $0x220] ss:$24 sps:$4 sm:$0xff]  }
 0x14b   :  { %1623 = vmatprep.subr.bf16.mxu0 %v3094_v24  ;;  %1705 = vmatprep.subr.bf16.mxu1 %v3097_v25  ;;  %v3166_v24 = vld [vmem:[#allocation2 + $0x254] ss:$24 sps:$4 sm:$0xff]   ;;  %v3164_v25 = vld [vmem:[#allocation2 + $0x250] ss:$24 sps:$4 sm:$0xff]  }
 0x14e   :  { %1624 = vmatpush1.bf16.msra.mxu0 %v3092_v26  ;;  %1706 = vmatpush1.bf16.msra.mxu1 %v3095_v27  ;;  %v3169_v26 = vld [vmem:[#allocation2 + $0x284] ss:$24 sps:$4 sm:$0xff]   ;;  %v3167_v27 = vld [vmem:[#allocation2 + $0x280] ss:$24 sps:$4 sm:$0xff]  }
 0x14f   :  { %1625 = vmatprep.subr.bf16.mxu0 %v3100_v28  ;;  %1707 = vmatprep.subr.bf16.mxu1 %v3103_v29  ;;  %v3172_v28 = vld [vmem:[#allocation2 + $0x2b4] ss:$24 sps:$4 sm:$0xff]   ;;  %v3170_v29 = vld [vmem:[#allocation2 + $0x2b0] ss:$24 sps:$4 sm:$0xff]  }
 0x152   :  { %1626 = vmatpush1.bf16.msra.mxu0 %v3098_v30  ;;  %1708 = vmatpush1.bf16.msra.mxu1 %v3101_v31  ;;  %v3175_v30 = vld [vmem:[#allocation2 + $0x2e4] ss:$24 sps:$4 sm:$0xff]   ;;  %v3173_v31 = vld [vmem:[#allocation2 + $0x2e0] ss:$24 sps:$4 sm:$0xff]  }
 0x153   :  { %1627 = vmatprep.subr.bf16.mxu0 %v3106_v32  ;;  %1709 = vmatprep.subr.bf16.mxu1 %v3109_v33  ;;  %v3178_v32 = vld [vmem:[#allocation2 + $0x314] ss:$24 sps:$4 sm:$0xff]   ;;  %v3176_v33 = vld [vmem:[#allocation2 + $0x310] ss:$24 sps:$4 sm:$0xff]  }
 0x156   :  { %1628 = vmatpush1.bf16.msra.mxu0 %v3104_v34  ;;  %1710 = vmatpush1.bf16.msra.mxu1 %v3107_v36  ;;  %v3181_v34 = vld [vmem:[#allocation2 + $0x344] ss:$24 sps:$4 sm:$0xff]   ;;  %v3179_v36 = vld [vmem:[#allocation2 + $0x340] ss:$24 sps:$4 sm:$0xff]  }
 0x157   :  { %1629 = vmatprep.subr.bf16.mxu0 %v3112_v37  ;;  %1711 = vmatprep.subr.bf16.mxu1 %v3115_v38  ;;  %v3184_v37 = vld [vmem:[#allocation2 + $0x374] ss:$24 sps:$4 sm:$0xff]   ;;  %v3182_v38 = vld [vmem:[#allocation2 + $0x370] ss:$24 sps:$4 sm:$0xff]  }
 0x15a   :  { %1630 = vmatpush1.bf16.msra.mxu0 %v3110_v39  ;;  %1712 = vmatpush1.bf16.msra.mxu1 %v3113_v40  ;;  %v3187_v39 = vld [vmem:[#allocation2 + $0x3a4] ss:$24 sps:$4 sm:$0xff]   ;;  %v3185_v40 = vld [vmem:[#allocation2 + $0x3a0] ss:$24 sps:$4 sm:$0xff]  }
 0x15b   :  { %1631 = vmatprep.subr.bf16.mxu0 %v3118_v41  ;;  %1713 = vmatprep.subr.bf16.mxu1 %v3121_v42  ;;  %v3190_v41 = vld [vmem:[#allocation2 + $0x3d4] ss:$24 sps:$4 sm:$0xff]   ;;  %v3188_v42 = vld [vmem:[#allocation2 + $0x3d0] ss:$24 sps:$4 sm:$0xff]  }
 0x15e   :  { %1632 = vmatpush1.bf16.msra.mxu0 %v3116_v44  ;;  %1714 = vmatpush1.bf16.msra.mxu1 %v3119_v45  ;;  %v3193_v44 = vld [vmem:[#allocation2 + $0x404] ss:$24 sps:$4 sm:$0xff]   ;;  %v3196_v45 = vld [vmem:[#allocation2 + $0x434] ss:$24 sps:$4 sm:$0xff]  }
 0x15f   :  { %1633 = vmatprep.subr.bf16.mxu0 %v3124_v47  ;;  %1715 = vmatprep.subr.bf16.mxu1 %v3127_v48  ;;  %v3237_v47 = vld [vmem:[%s3725_s5 + $0x30] sm:$0xff]  }
 0x160   :  { %v3194_v48 = vld [vmem:[#allocation2 + $0x430] ss:$24 sps:$4 sm:$0xff]  }
 0x162   :  { %1634 = vmatpush1.bf16.msra.mxu0 %v3122_v50  ;;  %1716 = vmatpush1.bf16.msra.mxu1 %v3125_v51  ;;  %v3199_v50 = vld [vmem:[#allocation2 + $0x464] ss:$24 sps:$4 sm:$0xff]  }
 0x163   :  { %1726 = vmatprep.subr.bf16.mxu0 %v3130_v52  ;;  %2657 = vmatprep.subr.bf16.mxu1 %v3224_v35  ;;  %v3239_v51 = vld [vmem:[%s3725_s5 + $0x38] sm:$0xff]   ;;  %v3200_v35 = vld [vmem:[#allocation2 + $0x490] ss:$24 sps:$4 sm:$0xff]  }
 0x164   :  { %v3197_v52 = vld [vmem:[#allocation2 + $0x460] ss:$24 sps:$4 sm:$0xff]  }
 0x165   :  { %1636 = vmatmul.mubr.bf16.vlgmr.msra.gmra.mrb[4].mxu0 %v3534_v53  ;;  %1718 = vmatmul.mubr.bf16.vlgmr.msra.gmra.mrb[8].mxu1 %v3534_v53 }
 0x166   :  { %1727 = vmatpush1.bf16.msra.mxu0 %v3128_v54  ;;  %1758 = vmatprep.mubr.bf16.mxu0 %v3521_v43  ;;  %v3229_v43 = vld [vmem:[%s3725_s5 + $0x10] sm:$0xff]   ;;  %v3240_v54 = vld [vmem:[%s3725_s5 + $0xc0] sm:$0xff]  }
 0x167   :  { %1728 = vmatprep.subr.bf16.mxu0 %v3133_v55  ;;  %2658 = vmatpush3.bf16.msra.mxu1 %v3225_v56  ;;  %v3202_v55 = vld [vmem:[#allocation2 + $0x494] ss:$24 sps:$4 sm:$0xff]   ;;  %v3205_v56 = vld [vmem:[#allocation2 + $0x4c4] ss:$24 sps:$4 sm:$0xff]  }
 0x168   :  { %2659 = vmatprep.subr.bf16.mxu1 %v3226_v57  ;;  %v3203_v57 = vld [vmem:[#allocation2 + $0x4c0] ss:$24 sps:$4 sm:$0xff]  }
 0x16a   :  { %1729 = vmatpush1.bf16.msra.mxu0 %v3131_v58  ;;  %v3208_v58 = vld [vmem:[#allocation2 + $0x4f4] ss:$24 sps:$4 sm:$0xff]  }
 0x16b   :  { %1730 = vmatprep.subr.bf16.mxu0 %v3136_v59  ;;  %2660 = vmatpush3.bf16.msra.mxu1 %v3227_v60  ;;  %v3206_v59 = vld [vmem:[#allocation2 + $0x4f0] ss:$24 sps:$4 sm:$0xff]   ;;  %v3211_v60 = vld [vmem:[#allocation2 + $0x524] ss:$24 sps:$4 sm:$0xff]  }
 0x16c   :  { %2661 = vmatprep.subr.bf16.mxu1 %v3228_v61  ;;  %v3209_v61 = vld [vmem:[#allocation2 + $0x520] ss:$24 sps:$4 sm:$0xff]  }
 0x16e   :  { %1731 = vmatpush1.bf16.msra.mxu0 %v3134_v62  ;;  %v3214_v62 = vld [vmem:[#allocation2 + $0x554] ss:$24 sps:$4 sm:$0xff]  }
 0x16f   :  { %1732 = vmatprep.subr.bf16.mxu0 %v3139_v63  ;;  %2662 = vmatpush3.bf16.msra.mxu1 %v3229_v43  ;;  %v3212_v63 = vld [vmem:[#allocation2 + $0x550] ss:$24 sps:$4 sm:$0xff]   ;;  %v3217_v43 = vld [vmem:[#allocation2 + $0x584] ss:$24 sps:$4 sm:$0xff]  }
 0x170   :  { %2663 = vmatprep.subr.bf16.mxu1 %v3230_v0  ;;  %v3215_v0 = vld [vmem:[#allocation2 + $0x580] ss:$24 sps:$4 sm:$0xff]  }
 0x172   :  { %1733 = vmatpush1.bf16.msra.mxu0 %v3137_v1  ;;  %v3220_v1 = vld [vmem:[#allocation2 + $0x5b4] ss:$24 sps:$4 sm:$0xff]  }
 0x173   :  { %1734 = vmatprep.subr.bf16.mxu0 %v3142_v2  ;;  %2664 = vmatpush3.bf16.msra.mxu1 %v3231_v3  ;;  %v3218_v2 = vld [vmem:[#allocation2 + $0x5b0] ss:$24 sps:$4 sm:$0xff]   ;;  %v3223_v3 = vld [vmem:[#allocation2 + $0x5e4] ss:$24 sps:$4 sm:$0xff]  }
 0x174   :  { %2665 = vmatprep.subr.bf16.mxu1 %v3232_v4  ;;  %v3221_v4 = vld [vmem:[#allocation2 + $0x5e0] ss:$24 sps:$4 sm:$0xff]  }
 0x176   :  { %1735 = vmatpush1.bf16.msra.mxu0 %v3140_v5  ;;  %v572_v5 = vlaneseq }
 0x177   :  { %1736 = vmatprep.subr.bf16.mxu0 %v3145_v6  ;;  %2666 = vmatpush3.bf16.msra.mxu1 %v3233_v7 }
 0x178   :  { %2667 = vmatprep.subr.bf16.mxu1 %v3234_v8  ;;  %v3593_v6 = vshrl.u32 %v572_v5, 7  ;;  %v3599_v8 = vld [vmem:[%s3724_s4] sm:$0x3f] }
 0x17a   :  { %1737 = vmatpush1.bf16.msra.mxu0 %v3143_v9  ;;  %v574_v7 = vsub.s32 0, %v3593_v6  ;;  %v578_v9 = vsub.s32 1, %v3593_v6 }
 0x17b   :  { %1738 = vmatprep.subr.bf16.mxu0 %v3148_v10  ;;  %2668 = vmatpush3.bf16.msra.mxu1 %v3235_v11  ;;  %v586_v10 = vsub.s32 3, %v3593_v6 }
 0x17c   :  { %v575_v11 = vrot.slane %v3599_v8, %v574_v7 }
 0x17e   :  { %1739 = vmatpush1.bf16.msra.mxu0 %v3146_v12  ;;  %v579_v12 = vrot.slane %v3599_v8, %v578_v9 }
 0x17f   :  { %1740 = vmatprep.subr.bf16.mxu0 %v3151_v14 }
 0x182   :  { %1741 = vmatpush1.bf16.msra.mxu0 %v3149_v15 }
 0x183   :  { %1742 = vmatprep.subr.bf16.mxu0 %v3154_v16 }
 0x186   :  { %1743 = vmatpush1.bf16.msra.mxu0 %v3152_v17 }
 0x187   :  { %1744 = vmatprep.subr.bf16.mxu0 %v3157_v18 }
 0x18a   :  { %1745 = vmatpush1.bf16.msra.mxu0 %v3155_v19 }
 0x18b   :  { %1746 = vmatprep.subr.bf16.mxu0 %v3160_v20 }
 0x18e   :  { %1747 = vmatpush1.bf16.msra.mxu0 %v3158_v21 }
 0x18f   :  { %1748 = vmatprep.subr.bf16.mxu0 %v3163_v22 }
 0x192   :  { %1749 = vmatpush1.bf16.msra.mxu0 %v3161_v23 }
 0x193   :  { %1750 = vmatprep.subr.bf16.mxu0 %v3166_v24 }
 0x196   :  { %1751 = vmatpush1.bf16.msra.mxu0 %v3164_v25 }
 0x197   :  { %1752 = vmatprep.subr.bf16.mxu0 %v3169_v26 }
 0x19a   :  { %1753 = vmatpush1.bf16.msra.mxu0 %v3167_v27 }
 0x19b   :  { %1754 = vmatprep.subr.bf16.mxu0 %v3172_v28 }
 0x19e   :  { %1755 = vmatpush1.bf16.msra.mxu0 %v3170_v29  ;;  %v3241_v29 = vld [vmem:[%s3725_s5 + $0x80] sm:$0xff]  }
 0x19f   :  { %1756 = vmatprep.subr.bf16.mxu0 %v3175_v30 }
 0x1a2   :  { %1757 = vmatpush1.bf16.msra.mxu0 %v3173_v31  ;;  %v3242_v31 = vld [vmem:[%s3725_s5 + $0xc8] sm:$0xff]  }
 0x1a3   :  { %1767 = vmatprep.subr.bf16.mxu0 %v3178_v32 }
 0x1a5   :  { %1759 = vmatmul.mubr.bf16.vlgmr.msra.gmra.mrb[8].mxu0 %v3523_v46  ;;  %v3191_v46 = vld [vmem:[#allocation2 + $0x400] ss:$24 sps:$4 sm:$0xff]  }
 0x1a6   :  { %1768 = vmatpush1.bf16.msra.mxu0 %v3176_v33  ;;  %1799 = vmatprep.mubr.bf16.mxu0 %v3529_v13  ;;  %v3236_v13 = vld [vmem:[%s3725_s5 + $0x70] sm:$0xff]   ;;  %v3243_v33 = vld [vmem:[%s3725_s5 + $0x88] sm:$0xff]  }
 0x1a7   :  { %1769 = vmatprep.subr.bf16.mxu0 %v3181_v34  ;;  %2669 = vmatprep.subr.bf16.mxu1 %v3236_v13  ;;  %v3244_v34 = vld [vmem:[%s3725_s5 + $0xd0] sm:$0xff]  }
 0x1a8   :  { %2670 = vmatpush3.bf16.msra.mxu1 %v3237_v47  ;;  %v3252_v13 = vld [vmem:[%s3725_s5 + $0xf0] sm:$0xff]  }
 0x1a9   :  { %2671 = vmatprep.subr.bf16.mxu1 %v3238_v49  ;;  %v3255_v49 = vld [vmem:[%s3725_s5 + $0xb8] sm:$0xff]  }
 0x1aa   :  { %1770 = vmatpush1.bf16.msra.mxu0 %v3179_v36  ;;  %v3245_v36 = vld [vmem:[%s3725_s5 + $0x90] sm:$0xff]  }
 0x1ab   :  { %1771 = vmatprep.subr.bf16.mxu0 %v3184_v37  ;;  %v3246_v37 = vld [vmem:[%s3725_s5 + $0xd8] sm:$0xff]  }
 0x1ac   :  { %2672 = vmatpush3.bf16.msra.mxu1 %v3239_v51  ;;  %v3256_v51 = vld [vmem:[%s3725_s5 + $0x140] sm:$0xff]  }
 0x1ad   :  { %2679 = vmatprep.subr.bf16.mxu1 %v3240_v54 }
 0x1ae   :  { %1772 = vmatpush1.bf16.msra.mxu0 %v3182_v38  ;;  %v3247_v38 = vld [vmem:[%s3725_s5 + $0x98] sm:$0xff]  }
 0x1af   :  { %1773 = vmatprep.subr.bf16.mxu0 %v3187_v39  ;;  %v3248_v39 = vld [vmem:[%s3725_s5 + $0xe0] sm:$0xff]  }
 0x1b2   :  { %1774 = vmatpush1.bf16.msra.mxu0 %v3185_v40  ;;  %v3249_v40 = vld [vmem:[%s3725_s5 + $0xa0] sm:$0xff]  }
 0x1b3   :  { %1775 = vmatprep.subr.bf16.mxu0 %v3190_v41  ;;  %v582_v41 = vsub.s32 2, %v3593_v6 }
 0x1b6   :  { %1776 = vmatpush1.bf16.msra.mxu0 %v3188_v42  ;;  %v3250_v42 = vld [vmem:[%s3725_s5 + $0xe8] sm:$0xff]  }
 0x1b7   :  { %1777 = vmatprep.subr.bf16.mxu0 %v3193_v44  ;;  %v3251_v44 = vld [vmem:[%s3725_s5 + $0xa8] sm:$0xff]  }
 0x1ba   :  { %1778 = vmatpush1.bf16.msra.mxu0 %v3191_v46  ;;  %v583_v46 = vrot.slane %v3599_v8, %v582_v41 }
 0x1bb   :  { %1779 = vmatprep.subr.bf16.mxu0 %v3196_v45  ;;  %v3253_v45 = vld [vmem:[%s3725_s5 + $0xb0] sm:$0xff]  }
 0x1be   :  { %1780 = vmatpush1.bf16.msra.mxu0 %v3194_v48  ;;  %v3254_v48 = vld [vmem:[%s3725_s5 + $0xf8] sm:$0xff]  }
 0x1bf   :  { %1781 = vmatprep.subr.bf16.mxu0 %v3199_v50 }
 0x1c2   :  { %1782 = vmatpush1.bf16.msra.mxu0 %v3197_v52  ;;  %v3257_v52 = vld [vmem:[%s3725_s5 + $0x100] sm:$0xff]  }
 0x1c3   :  { %1783 = vmatprep.subr.bf16.mxu0 %v3202_v55  ;;  %v3258_v55 = vld [vmem:[%s3725_s5 + $0x148] sm:$0xff]  }
 0x1c6   :  { %1784 = vmatpush1.bf16.msra.mxu0 %v3200_v35  ;;  %v3259_v35 = vld [vmem:[%s3725_s5 + $0x108] sm:$0xff]  }
 0x1c7   :  { %1785 = vmatprep.subr.bf16.mxu0 %v3205_v56  ;;  %v3260_v56 = vld [vmem:[%s3725_s5 + $0x150] sm:$0xff]  }
 0x1ca   :  { %1786 = vmatpush1.bf16.msra.mxu0 %v3203_v57  ;;  %v3261_v57 = vld [vmem:[%s3725_s5 + $0x110] sm:$0xff]  }
 0x1cb   :  { %1787 = vmatprep.subr.bf16.mxu0 %v3208_v58  ;;  %v3262_v58 = vld [vmem:[%s3725_s5 + $0x158] sm:$0xff]  }
 0x1ce   :  { %1788 = vmatpush1.bf16.msra.mxu0 %v3206_v59  ;;  %v3263_v59 = vld [vmem:[%s3725_s5 + $0x118] sm:$0xff]  }
 0x1cf   :  { %1789 = vmatprep.subr.bf16.mxu0 %v3211_v60  ;;  %v3264_v60 = vld [vmem:[%s3725_s5 + $0x160] sm:$0xff]  }
 0x1d2   :  { %1790 = vmatpush1.bf16.msra.mxu0 %v3209_v61  ;;  %v3265_v61 = vld [vmem:[%s3725_s5 + $0x120] sm:$0xff]  }
 0x1d3   :  { %1791 = vmatprep.subr.bf16.mxu0 %v3214_v62  ;;  %v3266_v62 = vld [vmem:[%s3725_s5 + $0x168] sm:$0xff]  }
 0x1d6   :  { %1792 = vmatpush1.bf16.msra.mxu0 %v3212_v63  ;;  %v3267_v63 = vld [vmem:[%s3725_s5 + $0x128] sm:$0xff]  }
 0x1d7   :  { %1793 = vmatprep.subr.bf16.mxu0 %v3217_v43  ;;  %v3268_v43 = vld [vmem:[%s3725_s5 + $0x170] sm:$0xff]  }
 0x1da   :  { %1794 = vmatpush1.bf16.msra.mxu0 %v3215_v0  ;;  %v3269_v0 = vld [vmem:[%s3725_s5 + $0x130] sm:$0xff]  }
 0x1db   :  { %1795 = vmatprep.subr.bf16.mxu0 %v3220_v1  ;;  %v3270_v1 = vld [vmem:[%s3725_s5 + $0x178] sm:$0xff]  }
 0x1de   :  { %1796 = vmatpush1.bf16.msra.mxu0 %v3218_v2  ;;  %v3271_v2 = vld [vmem:[%s3725_s5 + $0x138] sm:$0xff]  }
 0x1df   :  { %1797 = vmatprep.subr.bf16.mxu0 %v3223_v3  ;;  %v590_v3 = vsub.s32 4, %v3593_v6 }
 0x1e1   :  { %v591_v5 = vrot.slane %v3599_v8, %v590_v3 }
 0x1e2   :  { %1798 = vmatpush1.bf16.msra.mxu0 %v3221_v4  ;;  %v594_v4 = vsub.s32 5, %v3593_v6 }
 0x1e4   :  { %v595_v7 = vrot.slane %v3599_v8, %v594_v4 }
 0x1e5   :  { %1800 = vmatmul.mubr.bf16.vlgmr.msra.gmra.mrb[8].mxu0 %v3534_v53  ;;  %v587_v53 = vrot.slane %v3599_v8, %v586_v10  ;;  %v2552_v8 = vld [vmem:[%s3726_s6] ss:$0 sm:$0xff] }
 0x238   :  { %v1637_v14 = vpop.f32.mrb[4].mxu0  ;;  %v1719_v15 = vpop.f32.mrb[8].mxu1 }
 0x239   :  { %v2911_v16 = vadd.f32 %v1637_v14, %v575_v11  ;;  %v1639_v17 = vpop.f32.mrb[5].mxu0  ;;  %v1721_v18 = vpop.f32.mrb[9].mxu1  ;;  %v2913_v47 = vadd.f32 %v1719_v15, %v583_v46 }
 0x23a   :  { %v2912_v19 = vadd.f32 %v1639_v17, %v579_v12  ;;  %v2914_v20 = vadd.f32 %v1721_v18, %v587_v53  ;;  %v1641_v21 = vpop.f32.mrb[6].mxu0  ;;  %v1723_v22 = vpop.f32.mrb[10].mxu1 }
 0x23b   :  { %v1808_v23 = vmax.f32 %v2911_v16, 0.0  ;;  %v1642_v24 = vpop.f32.mrb[7].mxu0  ;;  %v1724_v25 = vpop.f32.mrb[11].mxu1  ;;  %v1810_v50 = vmax.f32 %v2913_v47, 0.0 }
 0x23c   :  { %v1809_v26 = vmax.f32 %v2912_v19, 0.0  ;;  %v1811_v27 = vmax.f32 %v2914_v20, 0.0 }
 0x23d   :  { %v1814_v30 = vpack.c.bf16 %v1808_v23, %v1808_v23  ;;  %v1816_v54 = vpack.c.bf16 %v1810_v50, %v1810_v50 }
 0x23e   :  { %v1815_v28 = vpack.c.bf16 %v1809_v26, %v1809_v26  ;;  %v1817_v32 = vpack.c.bf16 %v1811_v27, %v1811_v27 }
 0x240   :  { %2243 = vmatprep.mubr.bf16.mxu1 %v1815_v28 }
 0x241   :  { %2244 = vmatmul.mubr.bf16.vlgmr.msra.gmra.mrb[12].mxu1 %v1814_v30 }
 0x242   :  { %2680 = vmatpush3.bf16.msra.mxu1 %v3241_v29  ;;  %2283 = vmatprep.mubr.bf16.mxu1 %v1817_v32 }
 0x243   :  { %2681 = vmatprep.subr.bf16.mxu1 %v3242_v31 }
 0x246   :  { %2682 = vmatpush3.bf16.msra.mxu1 %v3243_v33 }
 0x247   :  { %2683 = vmatprep.subr.bf16.mxu1 %v3244_v34 }
 0x24a   :  { %2684 = vmatpush3.bf16.msra.mxu1 %v3245_v36 }
 0x24b   :  { %2685 = vmatprep.subr.bf16.mxu1 %v3246_v37 }
 0x24e   :  { %2686 = vmatpush3.bf16.msra.mxu1 %v3247_v38 }
 0x24f   :  { %2687 = vmatprep.subr.bf16.mxu1 %v3248_v39 }
 0x252   :  { %2688 = vmatpush3.bf16.msra.mxu1 %v3249_v40 }
 0x253   :  { %2689 = vmatprep.subr.bf16.mxu1 %v3250_v42 }
 0x256   :  { %2690 = vmatpush3.bf16.msra.mxu1 %v3251_v44 }
 0x257   :  { %2691 = vmatprep.subr.bf16.mxu1 %v3252_v13 }
 0x25a   :  { %2692 = vmatpush3.bf16.msra.mxu1 %v3253_v45 }
 0x25b   :  { %2693 = vmatprep.subr.bf16.mxu1 %v3254_v48 }
 0x25e   :  { %2694 = vmatpush3.bf16.msra.mxu1 %v3255_v49 }
 0x25f   :  { %2701 = vmatprep.subr.bf16.mxu1 %v3256_v51 }
 0x261   :  { %2284 = vmatmul.mubr.bf16.vlgmr.msra.gmra.mrb[16].mxu1 %v1816_v54 }
 0x262   :  { %2702 = vmatpush3.bf16.msra.mxu1 %v3257_v52 }
 0x263   :  { %2703 = vmatprep.subr.bf16.mxu1 %v3258_v55 }
 0x266   :  { %2704 = vmatpush3.bf16.msra.mxu1 %v3259_v35 }
 0x267   :  { %2705 = vmatprep.subr.bf16.mxu1 %v3260_v56 }
 0x26a   :  { %2706 = vmatpush3.bf16.msra.mxu1 %v3261_v57 }
 0x26b   :  { %2707 = vmatprep.subr.bf16.mxu1 %v3262_v58 }
 0x26e   :  { %2708 = vmatpush3.bf16.msra.mxu1 %v3263_v59 }
 0x26f   :  { %2709 = vmatprep.subr.bf16.mxu1 %v3264_v60 }
 0x272   :  { %2710 = vmatpush3.bf16.msra.mxu1 %v3265_v61 }
 0x273   :  { %2711 = vmatprep.subr.bf16.mxu1 %v3266_v62 }
 0x276   :  { %2712 = vmatpush3.bf16.msra.mxu1 %v3267_v63 }
 0x277   :  { %2713 = vmatprep.subr.bf16.mxu1 %v3268_v43 }
 0x27a   :  { %2714 = vmatpush3.bf16.msra.mxu1 %v3269_v0 }
 0x27b   :  { %2715 = vmatprep.subr.bf16.mxu1 %v3270_v1 }
 0x27e   :  { %2716 = vmatpush3.bf16.msra.mxu1 %v3271_v2 }
 0x2b8   :  { %v1801_v9 = vpop.f32.mrb[8].mxu0 }
 0x2b9   :  { %v2915_v10 = vadd.f32 %v1801_v9, %v591_v5  ;;  %v1803_v11 = vpop.f32.mrb[9].mxu0 }
 0x2ba   :  { %v2916_v12 = vadd.f32 %v1803_v11, %v595_v7  ;;  %v1805_v53 = vpop.f32.mrb[10].mxu0 }
 0x2bb   :  { %v1812_v14 = vmax.f32 %v2915_v10, 0.0  ;;  %v1806_v15 = vpop.f32.mrb[11].mxu0 }
 0x2bc   :  { %v1813_v16 = vmax.f32 %v2916_v12, 0.0 }
 0x2bd   :  { %v1818_v18 = vpack.c.bf16 %v1812_v14, %v1812_v14 }
 0x2be   :  { %v1819_v17 = vpack.c.bf16 %v1813_v16, %v1813_v16 }
 0x2c0   :  { %2323 = vmatprep.mubr.bf16.mxu1 %v1819_v17 }
 0x2c1   :  { %2324 = vmatmul.mubr.bf16.vlgmr.msra.gmra.mrb[20].mxu1 %v1818_v18 }
 0x314   :  { %v2673_v19 = vpop.f32.mrb[12].mxu1 }
 0x315   :  { %v2674_v20 = vpop.f32.mrb[13].mxu1 }
 0x316   :  { %v2675_v21 = vadd.f32 %v2674_v20, %v2673_v19  ;;  %v2676_v6 = vpop.f32.mrb[14].mxu1 }
 0x317   :  { %v2677_v22 = vpop.f32.mrb[15].mxu1 }
 0x318   :  { %v2246_v25 = vadd.f32 %v2675_v21, %v2552_v8 }
 0x334   :  { %v2695_v23 = vpop.f32.mrb[16].mxu1 }
 0x335   :  { %v2696_v24 = vpop.f32.mrb[17].mxu1 }
 0x336   :  { %v2697_v26 = vadd.f32 %v2696_v24, %v2695_v23  ;;  %v2698_v27 = vpop.f32.mrb[18].mxu1 }
 0x337   :  { %v2699_v28 = vpop.f32.mrb[19].mxu1 }
 0x338   :  { %v2286_v29 = vadd.f32 %v2697_v26, %v2246_v25 }
 0x394   :  { %v2717_v30 = vpop.f32.mrb[20].mxu1 }
 0x395   :  { %v2718_v31 = vpop.f32.mrb[21].mxu1 }
 0x396   :  { %v2719_v32 = vadd.f32 %v2718_v31, %v2717_v30  ;;  %v2720_v33 = vpop.f32.mrb[22].mxu1 }
 0x397   :  { %v2721_v34 = vpop.f32.mrb[23].mxu1 }
 0x398   :  { %v2326_v36 = vadd.f32 %v2719_v32, %v2286_v29 }
 0x39a   :  { %2332 = vst.msk [vmem:[#allocation5] sm:$0x3] %vm2331_vm3, %v2326_v36 }
 0x39b   :  { %3305 = shalt.err (!%p3302_p12)
}
 0x39c   :  { %s3306_s18 = scalar_lea.hbm %s3727_s7, 32 }
 0x39d   :  { %p3307_p13 = scmp.ne.s32.totalorder %s3727_s7, %s3306_s18  ;;  %p3310_p0 = scmp.lt.u32.totalorder %s3306_s18, %s3727_s7 }
 0x39f   :  { %p3312_p1 = pnand %p3310_p0, %p3307_p13 }
 0x3a1   :  { %3315 = shalt.err (!%p3312_p1)
}
 0x3a2   :  { %2342 = dma.vmem_to_hbm [thread:$0]  %s2340_s16, 32, %s3727_s7, [#allocation4]  }
 0x3a3   :  { %3318 = dma.done.wait [#allocation4], 32  }
 0x3a4   :  { %3319 = vsyncadd [#allocation4], 4294967264 }
 0x3a5   :  { %2346 = vsyncpa [#allocation3], 1 }
 0x3a6   :  { %2347 = vsyncpa [#allocation4], 1 }

</bundles_post_ra>
